<compile_context>
chip_gen: v5e
topology: v5e:2x2
jax: 0.10.0
libtpu: 0.0.40
codegen_flags: <defaults>
</compile_context>

<pallas_src>
import numpy as np
import jax
import jax.numpy as jnp
from jax.experimental import pallas as pl
from jax.experimental.pallas import tpu as pltpu


def _round_up(x, m):
    return ((x + m - 1) // m) * m


# Static module config (name, K, stride, padding) — matches the PyTorch spec.
_SCALES = (("conv5", 5, 2, 2), ("conv8", 8, 3, 2), ("conv12", 12, 4, 2))


# ----------------------------- Pallas kernel --------------------------------


def _fused_kernel(pT_ref, w_ref, b_ref, rT_ref, o_ref):
    """All 3 scales for one image: block-diag conv matmul + bilinear resize + bias.

    pT : (1, KC_P, SP_P)   bf16  block-diagonal transposed patch matrix (all scales)
    w  : (M_P, KC_P)       bf16  block-diagonal flattened conv weights (all scales)
    b  : (M_P, 1)          f32   biases, scale-major, zero padded
    rT : (SP_P, HW)        f32   row-stacked bilinear operators kron(rh, rw)^T
    o  : (1, 3*Cout, HW)   f32   final channel-concatenated, lane-dense output
    """
    # Conv for all scales as one MXU matmul (bf16 in, f32 acc).
    y = jnp.dot(w_ref[...], pT_ref[0], preferred_element_type=jnp.float32)   # (M_P, SP_P)
    # Bilinear resize for all scales as one more matmul, then bias.
    out = jnp.dot(y, rT_ref[...], preferred_element_type=jnp.float32)        # (M_P, HW)
    out = out + b_ref[...]
    o_ref[0] = out[: o_ref.shape[1], :]                                      # drop M padding rows


def _conv_resize_all_scales(pT, wb, bb, rT, *, c3, hw):
    n, kc_p, sp_p = pT.shape
    m_p = wb.shape[0]
    return pl.pallas_call(
        _fused_kernel,
        out_shape=jax.ShapeDtypeStruct((n, c3, hw), jnp.float32),
        grid=(n,),
        in_specs=[
            pl.BlockSpec((1, kc_p, sp_p), lambda i: (i, 0, 0)),   # per-image patches (pipelined)
            pl.BlockSpec((m_p, kc_p), lambda i: (0, 0)),          # resident weights (all scales)
            pl.BlockSpec((m_p, 1), lambda i: (0, 0)),             # resident biases
            pl.BlockSpec((sp_p, hw), lambda i: (0, 0)),           # resident resize operator
        ],
        out_specs=pl.BlockSpec((1, c3, hw), lambda i: (i, 0, 0)),
        compiler_params=pltpu.CompilerParams(
            dimension_semantics=("parallel",),          # megacore: split batch across TCs
            vmem_limit_bytes=32 * 1024 * 1024,          # v7x-safe; working set is < 2 MiB
        ),
    )(pT, wb, bb, rT)


# ----------------------------- JAX / numpy glue -------------------------------


def _im2col_T(x, K, S, P):
    """x: (N, C, H, W) -> transposed patch matrix (N, C*K*K, Ho*Wo).

    Row order of the Kc axis is (cin, kh, kw), matching PyTorch's Conv2d weight
    flattening w.reshape(Cout, Cin*K*K).
    """
    N, C, H, W = x.shape
    Ho = (H + 2 * P - K) // S + 1
    Wo = (W + 2 * P - K) // S + 1
    xp = jnp.pad(x, ((0, 0), (0, 0), (P, P), (P, P)))
    cols = []
    for kh in range(K):
        for kw in range(K):
            cols.append(
                xp[:, :, kh:kh + (Ho - 1) * S + 1:S, kw:kw + (Wo - 1) * S + 1:S]
            )                                           # each (N, C, Ho, Wo)
    cols = jnp.stack(cols, axis=2)                      # (N, C, K*K, Ho, Wo)
    return cols.reshape(N, C * K * K, Ho * Wo)


def _bilinear_matrix(out_size, in_size):
    """PyTorch F.interpolate(mode='bilinear', align_corners=False) as an (out,in) matrix."""
    scale = in_size / out_size
    i = np.arange(out_size, dtype=np.float64)
    src = np.maximum((i + 0.5) * scale - 0.5, 0.0)
    i0 = np.minimum(np.floor(src).astype(np.int64), in_size - 1)
    i1 = np.minimum(i0 + 1, in_size - 1)
    l1 = src - i0
    l0 = 1.0 - l1
    R = np.zeros((out_size, in_size), dtype=np.float32)
    np.add.at(R, (np.arange(out_size), i0), l0)
    np.add.at(R, (np.arange(out_size), i1), l1)
    return R


@jax.jit
def multi_scale_conv(x, params):
    """Forward pass of MultiScaleConv. x: (N, Cin, H, W) -> (N, 3*Cout, H, W)."""
    N, Cin, H, W = x.shape
    HW = H * W
    Cout = params["conv5"][0].shape[0]
    C3 = len(_SCALES) * Cout

    # Per-scale geometry and packing offsets along the shared Kc / Sp axes.
    geo = []
    kc_off, sp_off = 0, 0
    for name, K, S, P in _SCALES:
        Ho = (H + 2 * P - K) // S + 1
        Wo = (W + 2 * P - K) // S + 1
        Kc = Cin * K * K
        Sp = Ho * Wo
        geo.append((name, K, S, P, Ho, Wo, Kc, Sp, kc_off, sp_off))
        kc_off += Kc
        sp_off += Sp
    KC_P = _round_up(kc_off, 128)       # MXU-aligned contraction dim (932 -> 1024)
    SP_P = _round_up(sp_off, 128)       # lane-aligned packed spatial dim (98 -> 128)
    M_P = _round_up(C3, 8)              # sublane-aligned channel (M) dim (12 -> 16)

    # Block-diagonal packed operands: one conv matmul + one resize matmul covers all scales.
    pT = jnp.zeros((N, KC_P, SP_P), jnp.bfloat16)
    wb = jnp.zeros((M_P, KC_P), jnp.bfloat16)
    bb = jnp.zeros((M_P, 1), jnp.float32)
    rT_np = np.zeros((SP_P, HW), np.float32)
    for s, (name, K, S, P, Ho, Wo, Kc, Sp, ko, so) in enumerate(geo):
        w, b = params[name]                              # (Cout, Cin, K, K), (Cout,)
        patches = _im2col_T(x, K, S, P)                  # (N, Kc, Sp) f32
        pT = pT.at[:, ko:ko + Kc, so:so + Sp].set(patches.astype(jnp.bfloat16))
        wb = wb.at[s * Cout:(s + 1) * Cout, ko:ko + Kc].set(
            w.reshape(Cout, Kc).astype(jnp.bfloat16))
        bb = bb.at[s * Cout:(s + 1) * Cout, 0].set(b)
        # Bilinear resize operator (trace-time numpy constant).  Rows sum to 1, and the
        # conv-matmul output is exactly zero outside each scale's Sp block, so adding the
        # bias after the resize matmul is exact.
        rh = _bilinear_matrix(H, Ho)                     # (H, Ho)
        rw = _bilinear_matrix(W, Wo)                     # (W, Wo)
        rT_np[so:so + Sp, :] = np.kron(rh, rw).T         # (Sp, H*W)
    rT = jnp.asarray(rT_np)

    out = _conv_resize_all_scales(pT, wb, bb, rT, c3=C3, hw=HW)   # (N, 3*Cout, HW) f32
    return out.reshape(N, C3, H, W)                               # metadata-only reshape


# ----------------------------- main -------------------------------------------


if __name__ == "__main__":
    in_channels, out_channels = 4, 4
    N, H, W = 2, 16, 16

    key = jax.random.PRNGKey(0)
    kx, k5w, k5b, k8w, k8b, k12w, k12b = jax.random.split(key, 7)

    x = jax.random.normal(kx, (N, in_channels, H, W), dtype=jnp.float32)

    params = {
        "conv5": (
            0.05 * jax.random.normal(k5w, (out_channels, in_channels, 5, 5), jnp.float32),
            0.01 * jax.random.normal(k5b, (out_channels,), jnp.float32),
        ),
        "conv8": (
            0.05 * jax.random.normal(k8w, (out_channels, in_channels, 8, 8), jnp.float32),
            0.01 * jax.random.normal(k8b, (out_channels,), jnp.float32),
        ),
        "conv12": (
            0.05 * jax.random.normal(k12w, (out_channels, in_channels, 12, 12), jnp.float32),
            0.01 * jax.random.normal(k12b, (out_channels,), jnp.float32),
        ),
    }

    out = jax.block_until_ready(multi_scale_conv(x, params))

    expected_shape = (N, 3 * out_channels, H, W)
    assert out.shape == expected_shape, (out.shape, expected_shape)
    assert out.dtype == jnp.float32
    assert bool(jnp.all(jnp.isfinite(out)))
    print("KERNEL_OK")
</pallas_src>

<mosaic_0001>
module attributes {stable_mosaic.version = 11 : i64} {
  func.func @_fused_kernel(%arg0: i32, %arg1: memref<1x1024x128xbf16, #tpu.memory_space<vmem>>, %arg2: memref<16x1024xbf16, #tpu.memory_space<vmem>>, %arg3: memref<16x1xf32, #tpu.memory_space<vmem>>, %arg4: memref<128x256xf32, #tpu.memory_space<vmem>>, %arg5: memref<1x12x256xf32, #tpu.memory_space<vmem>>) attributes {dimension_semantics = [#tpu.dimension_semantics<parallel>], iteration_bounds = array<i64: 2>, scalar_prefetch = 0 : i64, scratch_operands = 0 : i64, tpu.core_type = #tpu.core_type<tc>, window_params = [{transform_indices = @transform_0, window_bounds = array<i64: 1, 1024, 128>}, {pipeline_mode = #tpu.pipeline_mode<synchronous>, transform_indices = @transform_1, window_bounds = array<i64: 16, 1024>}, {pipeline_mode = #tpu.pipeline_mode<synchronous>, transform_indices = @transform_2, window_bounds = array<i64: 16, 1>}, {pipeline_mode = #tpu.pipeline_mode<synchronous>, transform_indices = @transform_3, window_bounds = array<i64: 128, 256>}, {transform_indices = @transform_4, window_bounds = array<i64: 1, 12, 256>}]} {
    %c0 = arith.constant 0 : index
    %c0_0 = arith.constant 0 : index
    %0 = vector.load %arg2[%c0, %c0_0] : memref<16x1024xbf16, #tpu.memory_space<vmem>>, vector<16x1024xbf16>
    %c0_1 = arith.constant 0 : index
    %c0_2 = arith.constant 0 : index
    %c0_3 = arith.constant 0 : index
    %1 = vector.load %arg1[%c0_1, %c0_2, %c0_3] : memref<1x1024x128xbf16, #tpu.memory_space<vmem>>, vector<1x1024x128xbf16>
    %2 = vector.shape_cast %1 : vector<1x1024x128xbf16> to vector<1024x128xbf16>
    %cst = arith.constant dense<0.000000e+00> : vector<16x128xf32>
    %3 = tpu.matmul %0, %2, %cst {dimension_numbers = #tpu.dot_dimension_numbers<[1], [0], [0], [1], [0, 0, 1, 1], [], []>} : vector<16x1024xbf16>, vector<1024x128xbf16>, vector<16x128xf32> -> vector<16x128xf32>
    %c0_4 = arith.constant 0 : index
    %c0_5 = arith.constant 0 : index
    %4 = vector.load %arg4[%c0_4, %c0_5] : memref<128x256xf32, #tpu.memory_space<vmem>>, vector<128x256xf32>
    %cst_6 = arith.constant dense<0.000000e+00> : vector<16x256xf32>
    %5 = tpu.matmul %3, %4, %cst_6 {dimension_numbers = #tpu.dot_dimension_numbers<[1], [0], [0], [1], [0, 0, 1, 1], [], []>} : vector<16x128xf32>, vector<128x256xf32>, vector<16x256xf32> -> vector<16x256xf32>
    %c0_7 = arith.constant 0 : index
    %c0_8 = arith.constant 0 : index
    %6 = vector.load %arg3[%c0_7, %c0_8] : memref<16x1xf32, #tpu.memory_space<vmem>>, vector<16x1xf32>
    %7 = vector.broadcast %6 : vector<16x1xf32> to vector<16x256xf32>
    %8 = arith.addf %5, %7 : vector<16x256xf32>
    %9 = vector.extract_strided_slice %8 {offsets = [0, 0], sizes = [12, 256], strides = [1, 1]} : vector<16x256xf32> to vector<12x256xf32>
    %c0_9 = arith.constant 0 : index
    %c0_10 = arith.constant 0 : index
    %c0_11 = arith.constant 0 : index
    %10 = vector.load %arg5[%c0_9, %c0_10, %c0_11] : memref<1x12x256xf32, #tpu.memory_space<vmem>>, vector<1x12x256xf32>
    %11 = vector.shape_cast %10 : vector<1x12x256xf32> to vector<12x256xf32>
    %12 = vector.shape_cast %9 : vector<12x256xf32> to vector<1x12x256xf32>
    tpu.vector_store %arg5[%c0_9, %c0_10, %c0_11], %12 {strides = array<i32>} : memref<1x12x256xf32, #tpu.memory_space<vmem>>, vector<1x12x256xf32>,
    return
  }
  func.func @transform_0(%arg0: i32) -> (i32, i32, i32) {
    %c0_i32 = arith.constant 0 : i32
    %c0_i32_0 = arith.constant 0 : i32
    %c0_i32_1 = arith.constant 0 : i32
    return %arg0, %c0_i32, %c0_i32_0 : i32, i32, i32
  }
  func.func @transform_1(%arg0: i32) -> (i32, i32) {
    %c0_i32 = arith.constant 0 : i32
    %c0_i32_0 = arith.constant 0 : i32
    %c0_i32_1 = arith.constant 0 : i32
    return %c0_i32, %c0_i32_0 : i32, i32
  }
  func.func @transform_2(%arg0: i32) -> (i32, i32) {
    %c0_i32 = arith.constant 0 : i32
    %c0_i32_0 = arith.constant 0 : i32
    %c0_i32_1 = arith.constant 0 : i32
    return %c0_i32, %c0_i32_0 : i32, i32
  }
  func.func @transform_3(%arg0: i32) -> (i32, i32) {
    %c0_i32 = arith.constant 0 : i32
    %c0_i32_0 = arith.constant 0 : i32
    %c0_i32_1 = arith.constant 0 : i32
    return %c0_i32, %c0_i32_0 : i32, i32
  }
  func.func @transform_4(%arg0: i32) -> (i32, i32, i32) {
    %c0_i32 = arith.constant 0 : i32
    %c0_i32_0 = arith.constant 0 : i32
    %c0_i32_1 = arith.constant 0 : i32
    return %arg0, %c0_i32, %c0_i32_0 : i32, i32, i32
  }
}

</mosaic_0001>

<bundles_post_ra>
// kernel: multi_scale_conv.1
= control target key start
LH: loop header
LB: loop body
LE: loop exit
PB: predicated region body
PF: predicated region fallthrough
CT: control target
= control target key end

     0   :  { %s1468_s15 = smov 0   ;;  %s1705_s0 = inlined_call_operand.vmem [shape: bf16[2,1024,128], index: 0, kind: input, shape index: {}]   ;;  %s1706_s1 = inlined_call_operand.vmem [shape: bf16[16,1024], index: 1, kind: input, shape index: {}]   ;;  %s1707_s2 = inlined_call_operand.vmem [shape: f32[16,1], index: 2, kind: input, shape index: {}]   ;;  %s1708_s3 = inlined_call_operand.vmem [shape: f32[128,256], index: 3, kind: input, shape index: {}]   ;;  %s1709_s4 = inlined_call_operand.vmem [shape: f32[2,12,256], index: 4, kind: output, shape index: {}]  }
   0x1 LB: > { %s1019_s16 = sadd.s32 4294967295, %s1440_s15   ;;  %p1023_p0 = scmp.ge.s32.totalorder %s1440_s15, 1  ;;  %s1440_s15 = sphi %s1468_s15, %s14_s15  }
   0x2   : > { %p162_p1 = scmp.lt.s32.totalorder %s1440_s15, 3 }
   0x4   : > { %p163_p2 = pnand %p1023_p0, %p162_p1 }
   0x5   : > { %p188_p3 = scmp.lt.s32.totalorder (!%p163_p2), %s1019_s16, 1 }
   0x6   : > { %166 = sbr.rel (%p163_p2) target bundleno = 360 (0x168), region = 36 }
   0xb   : > { %s1711_s16 = smov (!%p188_p3, %s1019_s16), 1  ;;  %v1038_v34 = vld [vmem:[%s1706_s1 + $0x8] sm:$0xf]  ;;  %v1321_v36 = vld [vmem:[%s1706_s1 + $0xc] sm:$0xf] }
   0xc   : > { %s1318_s17 = sshll.u32 %s1711_s16, 9  ;;  %v1325_v35 = vld [vmem:[%s1706_s1 + $0x24] sm:$0xf0]  ;;  %v1040_v37 = vld [vmem:[%s1706_s1 + $0x28] sm:$0xf0]  ;;  %s1319_s25 = sshll.u32 %s1711_s16, 5 }
   0xd   : > { %s1482_s20 = scalar_lea.vmem %s1705_s0, %s1318_s17  ;;  %v1030_v38 = vld [vmem:[%s1706_s1] sm:$0xf]  ;;  %v1320_v40 = vld [vmem:[%s1706_s1 + $0x4] sm:$0xf]  ;;  %v1039_v44 = vor.u32 %v1325_v35, %v1038_v34  ;;  %v1043_v45 = vor.u32 %v1321_v36, %v1040_v37  ;;  %v891_v35 = vld [vmem:[%s1708_s3 + $0xa8] sm:$0xff]  ;;  %s197_s28 = scalar_lea.vmem %s1709_s4, %s1319_s25 }
   0xe   : > { %v1335_v0 = vld [vmem:[%s1482_s20 + $0x38] sm:$0xff]  ;;  %v1334_v4 = vld [vmem:[%s1482_s20 + $0x30] sm:$0xff]  ;;  %v1333_v8 = vld [vmem:[%s1482_s20 + $0x28] sm:$0xff] }
   0xf   : > { %v1343_v1 = vld [vmem:[%s1482_s20 + $0x78] sm:$0xff]  ;;  %758 = vmatpush.bf16.msra.mxu0 %v1335_v0  ;;  %v1342_v5 = vld [vmem:[%s1482_s20 + $0x70] sm:$0xff]  ;;  %v1341_v9 = vld [vmem:[%s1482_s20 + $0x68] sm:$0xff] }
  0x10   : > { %v1351_v2 = vld [vmem:[%s1482_s20 + $0xb8] sm:$0xff]  ;;  %772 = vmatpush.bf16.msra.mxu1 %v1343_v1  ;;  %v1350_v6 = vld [vmem:[%s1482_s20 + $0xb0] sm:$0xff]  ;;  %v1349_v10 = vld [vmem:[%s1482_s20 + $0xa8] sm:$0xff] }
  0x11   : > { %v1359_v3 = vld [vmem:[%s1482_s20 + $0xf8] sm:$0xff]  ;;  %786 = vmatpush.bf16.msra.mxu2 %v1351_v2  ;;  %v1358_v7 = vld [vmem:[%s1482_s20 + $0xf0] sm:$0xff]  ;;  %v1357_v11 = vld [vmem:[%s1482_s20 + $0xe8] sm:$0xff] }
  0x12   : > { %800 = vmatpush.bf16.msra.mxu3 %v1359_v3  ;;  %v1332_v12 = vld [vmem:[%s1482_s20 + $0x20] sm:$0xff]  ;;  %v1331_v16 = vld [vmem:[%s1482_s20 + $0x18] sm:$0xff]  ;;  %v1330_v20 = vld [vmem:[%s1482_s20 + $0x10] sm:$0xff] }
  0x13   : > { %759 = vmatpush.bf16.msra.mxu0 %v1334_v4  ;;  %v1340_v13 = vld [vmem:[%s1482_s20 + $0x60] sm:$0xff]  ;;  %v1339_v17 = vld [vmem:[%s1482_s20 + $0x58] sm:$0xff]  ;;  %v1338_v21 = vld [vmem:[%s1482_s20 + $0x50] sm:$0xff] }
  0x14   : > { %773 = vmatpush.bf16.msra.mxu1 %v1342_v5  ;;  %v1348_v14 = vld [vmem:[%s1482_s20 + $0xa0] sm:$0xff]  ;;  %v1347_v18 = vld [vmem:[%s1482_s20 + $0x98] sm:$0xff]  ;;  %v1346_v22 = vld [vmem:[%s1482_s20 + $0x90] sm:$0xff] }
  0x15   : > { %787 = vmatpush.bf16.msra.mxu2 %v1350_v6  ;;  %v1356_v15 = vld [vmem:[%s1482_s20 + $0xe0] sm:$0xff]  ;;  %v1355_v19 = vld [vmem:[%s1482_s20 + $0xd8] sm:$0xff]  ;;  %v1354_v23 = vld [vmem:[%s1482_s20 + $0xd0] sm:$0xff] }
  0x16   : > { %801 = vmatpush.bf16.msra.mxu3 %v1358_v7  ;;  %v1329_v24 = vld [vmem:[%s1482_s20 + $0x8] sm:$0xff]  ;;  %v1328_v28 = vld [vmem:[%s1482_s20] sm:$0xff]  ;;  %v1367_v32 = vld [vmem:[%s1482_s20 + $0x138] sm:$0xff] }
  0x17   : > { %760 = vmatpush.bf16.msra.mxu0 %v1333_v8  ;;  %v1337_v25 = vld [vmem:[%s1482_s20 + $0x48] sm:$0xff]  ;;  %v1336_v29 = vld [vmem:[%s1482_s20 + $0x40] sm:$0xff]  ;;  %v1375_v33 = vld [vmem:[%s1482_s20 + $0x178] sm:$0xff] }
  0x18   : > { %774 = vmatpush.bf16.msra.mxu1 %v1341_v9  ;;  %v1345_v26 = vld [vmem:[%s1482_s20 + $0x88] sm:$0xff]  ;;  %v1344_v30 = vld [vmem:[%s1482_s20 + $0x80] sm:$0xff]  ;;  %v1383_v42 = vld [vmem:[%s1482_s20 + $0x1b8] sm:$0xff] }
  0x19   : > { %788 = vmatpush.bf16.msra.mxu2 %v1349_v10  ;;  %v1353_v27 = vld [vmem:[%s1482_s20 + $0xc8] sm:$0xff]  ;;  %v1352_v31 = vld [vmem:[%s1482_s20 + $0xc0] sm:$0xff]  ;;  %v1391_v43 = vld [vmem:[%s1482_s20 + $0x1f8] sm:$0xff] }
  0x1a   : > { %802 = vmatpush.bf16.msra.mxu3 %v1357_v11  ;;  %v1324_v39 = vld [vmem:[%s1706_s1 + $0x1c] sm:$0xf0]  ;;  %v1032_v41 = vld [vmem:[%s1706_s1 + $0x20] sm:$0xf0]  ;;  %v1366_v48 = vld [vmem:[%s1482_s20 + $0x130] sm:$0xff] }
  0x1b   : > { %761 = vmatpush.bf16.msra.mxu0 %v1332_v12  ;;  %v1031_v46 = vor.u32 %v1324_v39, %v1030_v38  ;;  %v1035_v47 = vor.u32 %v1320_v40, %v1032_v41  ;;  %v1374_v49 = vld [vmem:[%s1482_s20 + $0x170] sm:$0xff]  ;;  %v1365_v52 = vld [vmem:[%s1482_s20 + $0x128] sm:$0xff]  ;;  %v1364_v56 = vld [vmem:[%s1482_s20 + $0x120] sm:$0xff] }
  0x1c   : > { %775 = vmatpush.bf16.msra.mxu1 %v1340_v13  ;;  %v1382_v50 = vld [vmem:[%s1482_s20 + $0x1b0] sm:$0xff]  ;;  %v1373_v53 = vld [vmem:[%s1482_s20 + $0x168] sm:$0xff]  ;;  %v1372_v57 = vld [vmem:[%s1482_s20 + $0x160] sm:$0xff] }
  0x1d   : > { %789 = vmatpush.bf16.msra.mxu2 %v1348_v14  ;;  %v1390_v51 = vld [vmem:[%s1482_s20 + $0x1f0] sm:$0xff]  ;;  %v1381_v54 = vld [vmem:[%s1482_s20 + $0x1a8] sm:$0xff]  ;;  %v1380_v58 = vld [vmem:[%s1482_s20 + $0x1a0] sm:$0xff] }
  0x1e   : > { %803 = vmatpush.bf16.msra.mxu3 %v1356_v15  ;;  %v1389_v55 = vld [vmem:[%s1482_s20 + $0x1e8] sm:$0xff]  ;;  %v1388_v59 = vld [vmem:[%s1482_s20 + $0x1e0] sm:$0xff]  ;;  %v1363_v60 = vld [vmem:[%s1482_s20 + $0x118] sm:$0xff] }
  0x1f   : > { %762 = vmatpush.bf16.msra.mxu0 %v1331_v16  ;;  %v1371_v61 = vld [vmem:[%s1482_s20 + $0x158] sm:$0xff]  ;;  %v1362_v0 = vld [vmem:[%s1482_s20 + $0x110] sm:$0xff]  ;;  %v1361_v4 = vld [vmem:[%s1482_s20 + $0x108] sm:$0xff] }
  0x20   : > { %776 = vmatpush.bf16.msra.mxu1 %v1339_v17  ;;  %v1379_v62 = vld [vmem:[%s1482_s20 + $0x198] sm:$0xff]  ;;  %v1370_v1 = vld [vmem:[%s1482_s20 + $0x150] sm:$0xff]  ;;  %v1369_v5 = vld [vmem:[%s1482_s20 + $0x148] sm:$0xff] }
  0x21   : > { %790 = vmatpush.bf16.msra.mxu2 %v1347_v18  ;;  %v1387_v63 = vld [vmem:[%s1482_s20 + $0x1d8] sm:$0xff]  ;;  %v1378_v2 = vld [vmem:[%s1482_s20 + $0x190] sm:$0xff]  ;;  %v1377_v6 = vld [vmem:[%s1482_s20 + $0x188] sm:$0xff] }
  0x22   : > { %804 = vmatpush.bf16.msra.mxu3 %v1355_v19  ;;  %v1386_v3 = vld [vmem:[%s1482_s20 + $0x1d0] sm:$0xff]  ;;  %v1385_v7 = vld [vmem:[%s1482_s20 + $0x1c8] sm:$0xff]  ;;  %v1360_v8 = vld [vmem:[%s1482_s20 + $0x100] sm:$0xff] }
  0x23   : > { %763 = vmatpush.bf16.msra.mxu0 %v1330_v20  ;;  %v1368_v9 = vld [vmem:[%s1482_s20 + $0x140] sm:$0xff]  ;;  %v1046_v12 = vld [vmem:[%s1706_s1 + $0x10] sm:$0xf]  ;;  %v1322_v14 = vld [vmem:[%s1706_s1 + $0x14] sm:$0xf] }
  0x24   : > { %777 = vmatpush.bf16.msra.mxu1 %v1338_v21  ;;  %v1376_v10 = vld [vmem:[%s1482_s20 + $0x180] sm:$0xff]  ;;  %v1326_v13 = vld [vmem:[%s1706_s1 + $0x2c] sm:$0xf0]  ;;  %v1048_v15 = vld [vmem:[%s1706_s1 + $0x30] sm:$0xf0] }
  0x25   : > { %791 = vmatpush.bf16.msra.mxu2 %v1346_v22  ;;  %v1384_v11 = vld [vmem:[%s1482_s20 + $0x1c0] sm:$0xff]  ;;  %v1054_v16 = vld [vmem:[%s1706_s1 + $0x18] sm:$0xf]  ;;  %v1323_v18 = vld [vmem:[%s1706_s1 + $0x1c] sm:$0xf]  ;;  %v1047_v20 = vor.u32 %v1326_v13, %v1046_v12  ;;  %v1051_v21 = vor.u32 %v1322_v14, %v1048_v15 }
  0x26   : > { %805 = vmatpush.bf16.msra.mxu3 %v1354_v23  ;;  %v1327_v17 = vld [vmem:[%s1706_s1 + $0x34] sm:$0xf0]  ;;  %v1056_v19 = vld [vmem:[%s1706_s1 + $0x38] sm:$0xf0]  ;;  %v890_v34 = vld [vmem:[%s1708_s3 + $0xa0] sm:$0xff] }
  0x27   : > { %764 = vmatpush.bf16.msra.mxu0 %v1329_v24  ;;  %v1055_v22 = vor.u32 %v1327_v17, %v1054_v16  ;;  %v1059_v23 = vor.u32 %v1323_v18, %v1056_v19  ;;  %v900_v24 = vld [vmem:[%s1708_s3 + $0xf0] sm:$0xff]  ;;  %v889_v37 = vld [vmem:[%s1708_s3 + $0x98] sm:$0xff]  ;;  %v886_v38 = vld [vmem:[%s1708_s3 + $0x80] sm:$0xff] }
  0x28   : > { %778 = vmatpush.bf16.msra.mxu1 %v1337_v25  ;;  %v901_v25 = vld [vmem:[%s1708_s3 + $0xf8] sm:$0xff]  ;;  %v888_v36 = vld [vmem:[%s1708_s3 + $0x90] sm:$0xff]  ;;  %v887_v39 = vld [vmem:[%s1708_s3 + $0x88] sm:$0xff] }
  0x29   : > { %792 = vmatpush.bf16.msra.mxu2 %v1345_v26  ;;  %v898_v26 = vld [vmem:[%s1708_s3 + $0xe0] sm:$0xff]  ;;  %v884_v40 = vld [vmem:[%s1708_s3 + $0x70] sm:$0xff]  ;;  %v885_v41 = vld [vmem:[%s1708_s3 + $0x78] sm:$0xff] }
  0x2a   : > { %806 = vmatpush.bf16.msra.mxu3 %v1353_v27  ;;  %v899_v27 = vld [vmem:[%s1708_s3 + $0xe8] sm:$0xff] }
  0x2b   : > { %765 = vmatpush.bf16.msra.mxu0 %v1328_v28  ;;  %v896_v28 = vld [vmem:[%s1708_s3 + $0xd0] sm:$0xff] }
  0x2c   : > { %779 = vmatpush.bf16.msra.mxu1 %v1336_v29  ;;  %v897_v29 = vld [vmem:[%s1708_s3 + $0xd8] sm:$0xff] }
  0x2d   : > { %793 = vmatpush.bf16.msra.mxu2 %v1344_v30  ;;  %v894_v30 = vld [vmem:[%s1708_s3 + $0xc0] sm:$0xff] }
  0x2e   : > { %807 = vmatpush.bf16.msra.mxu3 %v1352_v31  ;;  %766 = vmatmul.bf16.vlgmr.msra.gmra.mxu0 %v1031_v46  ;;  %v895_v31 = vld [vmem:[%s1708_s3 + $0xc8] sm:$0xff]  ;;  %v878_v46 = vld [vmem:[%s1708_s3 + $0x40] sm:$0xff] }
  0x2f   : > { %814 = vmatpush.bf16.msrb.mxu0 %v1367_v32  ;;  %780 = vmatmul.bf16.vlgmr.msra.gmra.mxu1 %v1035_v47  ;;  %v892_v32 = vld [vmem:[%s1708_s3 + $0xb0] sm:$0xff]  ;;  %v879_v47 = vld [vmem:[%s1708_s3 + $0x48] sm:$0xff] }
  0x30   : > { %828 = vmatpush.bf16.msrb.mxu1 %v1375_v33  ;;  %794 = vmatmul.bf16.vlgmr.msra.gmra.mxu2 %v1039_v44  ;;  %v893_v33 = vld [vmem:[%s1708_s3 + $0xb8] sm:$0xff]  ;;  %v880_v44 = vld [vmem:[%s1708_s3 + $0x50] sm:$0xff] }
  0x31   : > { %842 = vmatpush.bf16.msrb.mxu2 %v1383_v42  ;;  %808 = vmatmul.bf16.vlgmr.msra.gmra.mxu3 %v1043_v45  ;;  %v882_v42 = vld [vmem:[%s1708_s3 + $0x60] sm:$0xff]  ;;  %v881_v45 = vld [vmem:[%s1708_s3 + $0x58] sm:$0xff] }
  0x32   : > { %856 = vmatpush.bf16.msrb.mxu3 %v1391_v43  ;;  %v883_v43 = vld [vmem:[%s1708_s3 + $0x68] sm:$0xff] }
  0x33   : > { %815 = vmatpush.bf16.msrb.mxu0 %v1366_v48  ;;  %v876_v48 = vld [vmem:[%s1708_s3 + $0x30] sm:$0xff] }
  0x34   : > { %829 = vmatpush.bf16.msrb.mxu1 %v1374_v49  ;;  %v877_v49 = vld [vmem:[%s1708_s3 + $0x38] sm:$0xff] }
  0x35   : > { %843 = vmatpush.bf16.msrb.mxu2 %v1382_v50  ;;  %v874_v50 = vld [vmem:[%s1708_s3 + $0x20] sm:$0xff] }
  0x36   : > { %857 = vmatpush.bf16.msrb.mxu3 %v1390_v51  ;;  %v875_v51 = vld [vmem:[%s1708_s3 + $0x28] sm:$0xff] }
  0x37   : > { %816 = vmatpush.bf16.msrb.mxu0 %v1365_v52  ;;  %v872_v52 = vld [vmem:[%s1708_s3 + $0x10] sm:$0xff] }
  0x38   : > { %830 = vmatpush.bf16.msrb.mxu1 %v1373_v53  ;;  %v873_v53 = vld [vmem:[%s1708_s3 + $0x18] sm:$0xff] }
  0x39   : > { %844 = vmatpush.bf16.msrb.mxu2 %v1381_v54  ;;  %v870_v54 = vld [vmem:[%s1708_s3] sm:$0xff] }
  0x3a   : > { %858 = vmatpush.bf16.msrb.mxu3 %v1389_v55  ;;  %v871_v55 = vld [vmem:[%s1708_s3 + $0x8] sm:$0xff] }
  0x3b   : > { %817 = vmatpush.bf16.msrb.mxu0 %v1364_v56 }
  0x3c   : > { %831 = vmatpush.bf16.msrb.mxu1 %v1372_v57 }
  0x3d   : > { %845 = vmatpush.bf16.msrb.mxu2 %v1380_v58  ;;  %v1442_v58 = vmov 0  }
  0x3e   : > { %859 = vmatpush.bf16.msrb.mxu3 %v1388_v59  ;;  %1433 = vset.pattern.permute.xlu0 %v1442_v58  ;;  %v902_v59 = vld [vmem:[%s1707_s2] sm:$0xff] }
  0x3f   : > { %818 = vmatpush.bf16.msrb.mxu0 %v1363_v60  ;;  %906 = vperm.xlu0 %1433, %v902_v59  }
  0x40   : > { %832 = vmatpush.bf16.msrb.mxu1 %v1371_v61 }
  0x41   : > { %846 = vmatpush.bf16.msrb.mxu2 %v1379_v62 }
  0x42   : > { %860 = vmatpush.bf16.msrb.mxu3 %v1387_v63 }
  0x43   : > { %819 = vmatpush.bf16.msrb.mxu0 %v1362_v0  ;;  %v903_v0 = vld [vmem:[%s1707_s2 + $0x8] sm:$0xff] }
  0x44   : > { %833 = vmatpush.bf16.msrb.mxu1 %v1370_v1 }
  0x45   : > { %847 = vmatpush.bf16.msrb.mxu2 %v1378_v2 }
  0x46   : > { %861 = vmatpush.bf16.msrb.mxu3 %v1386_v3 }
  0x47   : > { %820 = vmatpush.bf16.msrb.mxu0 %v1361_v4  ;;  %911 = vperm.xlu0 %1433, %v903_v0  }
  0x48   : > { %834 = vmatpush.bf16.msrb.mxu1 %v1369_v5 }
  0x49   : > { %848 = vmatpush.bf16.msrb.mxu2 %v1377_v6 }
  0x4a   : > { %862 = vmatpush.bf16.msrb.mxu3 %v1385_v7 }
  0x4b   : > { %821 = vmatpush.bf16.msrb.mxu0 %v1360_v8 }
  0x4c   : > { %835 = vmatpush.bf16.msrb.mxu1 %v1368_v9 }
  0x4d   : > { %849 = vmatpush.bf16.msrb.mxu2 %v1376_v10 }
  0x4e   : > { %863 = vmatpush.bf16.msrb.mxu3 %v1384_v11  ;;  %822 = vmatmul.bf16.vlgmr.msrb.gmra.mxu0 %v1047_v20 }
  0x4f   : > { %836 = vmatmul.bf16.vlgmr.msrb.gmra.mxu1 %v1051_v21  ;;  %914 = vmatpush.msra.mxu0 %v900_v24 }
  0x50   : > { %850 = vmatmul.bf16.vlgmr.msrb.gmra.mxu2 %v1055_v22  ;;  %937 = vmatpush.msra.mxu1 %v901_v25 }
  0x51   : > { %864 = vmatmul.bf16.vlgmr.msrb.gmra.mxu3 %v1059_v23  ;;  %1392 = vmatpush.msra.mxu2 %v900_v24 }
  0x52   : > { %1408 = vmatpush.msra.mxu3 %v901_v25  ;;  %915 = vmatpush.msra.mxu0 %v898_v26 }
  0x53   : > { %938 = vmatpush.msra.mxu1 %v899_v27  ;;  %1393 = vmatpush.msra.mxu2 %v898_v26 }
  0x54   : > { %1409 = vmatpush.msra.mxu3 %v899_v27  ;;  %916 = vmatpush.msra.mxu0 %v896_v28 }
  0x55   : > { %939 = vmatpush.msra.mxu1 %v897_v29  ;;  %1394 = vmatpush.msra.mxu2 %v896_v28 }
  0x56   : > { %1410 = vmatpush.msra.mxu3 %v897_v29  ;;  %917 = vmatpush.msra.mxu0 %v894_v30 }
  0x57   : > { %940 = vmatpush.msra.mxu1 %v895_v31  ;;  %1395 = vmatpush.msra.mxu2 %v894_v30 }
  0x58   : > { %1411 = vmatpush.msra.mxu3 %v895_v31  ;;  %918 = vmatpush.msra.mxu0 %v892_v32 }
  0x59   : > { %941 = vmatpush.msra.mxu1 %v893_v33  ;;  %1396 = vmatpush.msra.mxu2 %v892_v32 }
  0x5a   : > { %1412 = vmatpush.msra.mxu3 %v893_v33  ;;  %919 = vmatpush.msra.mxu0 %v890_v34 }
  0x5b   : > { %942 = vmatpush.msra.mxu1 %v891_v35  ;;  %1397 = vmatpush.msra.mxu2 %v890_v34 }
  0x5c   : > { %1413 = vmatpush.msra.mxu3 %v891_v35  ;;  %920 = vmatpush.msra.mxu0 %v888_v36 }
  0x5d   : > { %943 = vmatpush.msra.mxu1 %v889_v37  ;;  %1398 = vmatpush.msra.mxu2 %v888_v36 }
  0x5e   : > { %1414 = vmatpush.msra.mxu3 %v889_v37  ;;  %921 = vmatpush.msra.mxu0 %v886_v38 }
  0x5f   : > { %944 = vmatpush.msra.mxu1 %v887_v39  ;;  %1399 = vmatpush.msra.mxu2 %v886_v38 }
  0x60   : > { %1415 = vmatpush.msra.mxu3 %v887_v39  ;;  %922 = vmatpush.msra.mxu0 %v884_v40 }
  0x61   : > { %945 = vmatpush.msra.mxu1 %v885_v41  ;;  %1400 = vmatpush.msra.mxu2 %v884_v40 }
  0x62   : > { %1416 = vmatpush.msra.mxu3 %v885_v41  ;;  %923 = vmatpush.msra.mxu0 %v882_v42 }
  0x63   : > { %946 = vmatpush.msra.mxu1 %v883_v43  ;;  %1401 = vmatpush.msra.mxu2 %v882_v42 }
  0x64   : > { %1417 = vmatpush.msra.mxu3 %v883_v43  ;;  %924 = vmatpush.msra.mxu0 %v880_v44 }
  0x65   : > { %947 = vmatpush.msra.mxu1 %v881_v45  ;;  %1402 = vmatpush.msra.mxu2 %v880_v44 }
  0x66   : > { %1418 = vmatpush.msra.mxu3 %v881_v45  ;;  %925 = vmatpush.msra.mxu0 %v878_v46 }
  0x67   : > { %948 = vmatpush.msra.mxu1 %v879_v47  ;;  %1403 = vmatpush.msra.mxu2 %v878_v46 }
  0x68   : > { %1419 = vmatpush.msra.mxu3 %v879_v47  ;;  %926 = vmatpush.msra.mxu0 %v876_v48 }
  0x69   : > { %949 = vmatpush.msra.mxu1 %v877_v49  ;;  %1404 = vmatpush.msra.mxu2 %v876_v48 }
  0x6a   : > { %1420 = vmatpush.msra.mxu3 %v877_v49  ;;  %927 = vmatpush.msra.mxu0 %v874_v50 }
  0x6b   : > { %950 = vmatpush.msra.mxu1 %v875_v51  ;;  %1405 = vmatpush.msra.mxu2 %v874_v50 }
  0x6c   : > { %1421 = vmatpush.msra.mxu3 %v875_v51  ;;  %928 = vmatpush.msra.mxu0 %v872_v52 }
  0x6d   : > { %951 = vmatpush.msra.mxu1 %v873_v53  ;;  %1406 = vmatpush.msra.mxu2 %v872_v52 }
  0x6e   : > { %1422 = vmatpush.msra.mxu3 %v873_v53  ;;  %929 = vmatpush.msra.mxu0 %v870_v54 }
  0x6f   : > { %952 = vmatpush.msra.mxu1 %v871_v55  ;;  %1407 = vmatpush.msra.mxu2 %v870_v54 }
  0x70   : > { %1423 = vmatpush.msra.mxu3 %v871_v55 }
  0xab   : > { %v767_v56 = vpop.f32.mrf.mxu0 }
  0xac   : > { %v781_v57 = vpop.f32.mrf.mxu1 }
  0xad   : > { %v782_v62 = vadd.f32 %v781_v57, %v767_v56 }
  0xb1   : > { %v907_v25 = vpop.permute.xlu0 %906 }
  0xb3   : > { %v795_v60 = vpop.f32.mrf.mxu2  ;;  %v769_v63 = vpop.f32.mrf.mxu0 }
  0xb4   : > { %v809_v61 = vpop.f32.mrf.mxu3  ;;  %v783_v1 = vpop.f32.mrf.mxu1  ;;  %v796_v2 = vadd.f32 %v795_v60, %v782_v62 }
  0xb5   : > { %v784_v6 = vadd.f32 %v783_v1, %v769_v63 }
  0xb6   : > { %v810_v5 = vadd.f32 %v809_v61, %v796_v2 }
  0xb9   : > { %v912_v30 = vpop.permute.xlu0 %911 }
  0xbb   : > { %v797_v3 = vpop.f32.mrf.mxu2 }
  0xbc   : > { %v811_v4 = vpop.f32.mrf.mxu3  ;;  %v798_v10 = vadd.f32 %v797_v3, %v784_v6 }
  0xbe   : > { %v812_v14 = vadd.f32 %v811_v4, %v798_v10 }
  0xcb   : > { %v823_v7 = vpop.f32.mrf.mxu0 }
  0xcc   : > { %v824_v8 = vadd.f32 %v823_v7, %v810_v5  ;;  %v837_v9 = vpop.f32.mrf.mxu1 }
  0xce   : > { %v838_v11 = vadd.f32 %v837_v9, %v824_v8 }
  0xd3   : > { %v851_v12 = vpop.f32.mrf.mxu2  ;;  %v825_v16 = vpop.f32.mrf.mxu0 }
  0xd4   : > { %v865_v13 = vpop.f32.mrf.mxu3  ;;  %v852_v15 = vadd.f32 %v851_v12, %v838_v11  ;;  %v826_v18 = vadd.f32 %v825_v16, %v812_v14  ;;  %v839_v19 = vpop.f32.mrf.mxu1 }
  0xd6   : > { %v866_v17 = vadd.f32 %v865_v13, %v852_v15  ;;  %v840_v20 = vadd.f32 %v839_v19, %v826_v18 }
  0xd8   : > { %930 = vmatmul.f32.vlgmr.msra.gmra.mxu0 %v866_v17  ;;  %953 = vmatmul.f32.vlgmr.msra.gmra.mxu1 %v866_v17 }
  0xdb   : > { %v853_v21 = vpop.f32.mrf.mxu2 }
  0xdc   : > { %v854_v22 = vadd.f32 %v853_v21, %v840_v20  ;;  %v867_v23 = vpop.f32.mrf.mxu3 }
  0xde   : > { %v868_v24 = vadd.f32 %v867_v23, %v854_v22 }
  0xe0   : > { %933 = vmatmul.f32.vlgmr.msra.gmra.mxu2 %v868_v24  ;;  %956 = vmatmul.f32.vlgmr.msra.gmra.mxu3 %v868_v24 }
 0x155   : > { %v931_v26 = vpop.f32.mrf.mxu0  ;;  %v954_v27 = vpop.f32.mrf.mxu1 }
 0x156   : > { %v932_v28 = vadd.f32 %v931_v26, %v907_v25  ;;  %v955_v29 = vadd.f32 %v954_v27, %v907_v25 }
 0x158   : > { %960 = vst [vmem:[%s197_s28] sm:$0xff] %v932_v28 }
 0x159   : > { %961 = vst [vmem:[%s197_s28 + $0x8] sm:$0xff] %v955_v29 }
 0x163   : > { %v934_v31 = vpop.f32.mrf.mxu2  ;;  %v957_v32 = vpop.f32.mrf.mxu3 }
 0x164   : > { %v935_v33 = vadd.f32 %v934_v31, %v912_v30  ;;  %v958_v34 = vadd.f32 %v957_v32, %v912_v30 }
 0x166   : > { %962 = vst [vmem:[%s197_s28 + $0x10] sm:$0xf] %v935_v33 }
 0x167   : > { %963 = vst [vmem:[%s197_s28 + $0x18] sm:$0xf] %v958_v34 }
 0x168 PF: > { %s14_s15 = sadd.s32 1, %s1440_s15  }
 0x169   : > { %p11_p4 = scmp.ge.s32.totalorder %s14_s15, 4  }
 0x16b   :  { %13 = sbr.rel (!%p11_p4) target bundleno = 1 (0x1), region = 66 }

</bundles_post_ra>
